<compile_context>
chip_gen: v5e
topology: v5e:2x2
jax: 0.10.0
libtpu: 0.0.40
codegen_flags: <defaults>
</compile_context>

<pallas_src>
import functools

import jax
import jax.numpy as jnp
from jax.experimental import pallas as pl
from jax.experimental.pallas import tpu as pltpu

_LANE = 128
_SUBLANE = 8


def _round_up(n, m):
    return ((n + m - 1) // m) * m


def tiny_dnn_kernel(x_ref, w1_ref, b1_ref, w2_ref, b2_ref, o_ref):
    # fc1: (TB, I) @ (I, Hp) + (1, Hp), then ReLU (all f32 on the VPU).
    h = jnp.dot(
        x_ref[...], w1_ref[...],
        preferred_element_type=jnp.float32,
        precision=jax.lax.Precision.HIGHEST,
    )
    h = jnp.maximum(h + b1_ref[...], 0.0)
    # fc2: (TB, Hp) @ (Hp, Cp) + (1, Cp)
    out = jnp.dot(
        h, w2_ref[...],
        preferred_element_type=jnp.float32,
        precision=jax.lax.Precision.HIGHEST,
    )
    o_ref[...] = (out + b2_ref[...]).astype(o_ref.dtype)


def prepare_tiny_dnn_params(w1, b1, w2, b2):
    """One-time (init/load-time) lane-padding of the parameters.

    w1: (I, H), b1: (H,), w2: (H, C), b2: (C,)  ->  padded to 128-lane H/C.
    Zero padding keeps the math exact: ReLU(x @ 0 + 0) = 0 contributes nothing
    to fc2, and the padded class columns are sliced off after the kernel.
    """
    I, H = w1.shape
    C = w2.shape[1]
    Hp = _round_up(H, _LANE)
    Cp = _round_up(C, _LANE)
    w1p = jnp.zeros((I, Hp), w1.dtype).at[:, :H].set(w1)
    b1p = jnp.zeros((1, Hp), b1.dtype).at[:, :H].set(b1.reshape(1, H))
    w2p = jnp.zeros((Hp, Cp), w2.dtype).at[:H, :C].set(w2)
    b2p = jnp.zeros((1, Cp), b2.dtype).at[:, :C].set(b2.reshape(1, C))
    return w1p, b1p, w2p, b2p


@functools.partial(jax.jit, static_argnames=("num_classes", "batch_tile"))
def tiny_dnn(x, w1p, b1p, w2p, b2p, *, num_classes, batch_tile=1024):
    """x: (B, I) f32; padded params from prepare_tiny_dnn_params()."""
    B, I = x.shape
    Hp = w1p.shape[1]
    Cp = w2p.shape[1]

    # Batch tile: big (amortizes ~0.35us/step pipeline overhead and fills the
    # 256-wide MXU on v6e/v7x) but capped so the grid keeps >=4 steps when B
    # allows it (v7x megacore). Always a multiple of the 8-row sublane.
    TB = max(_SUBLANE, min(batch_tile, _round_up(pl.cdiv(B, 4), _SUBLANE)))
    grid = (pl.cdiv(B, TB),)

    cost = pl.CostEstimate(
        flops=2 * B * (I * Hp + Hp * Cp),
        transcendentals=0,
        bytes_accessed=4 * (B * I + I * Hp + Hp + Hp * Cp + Cp + B * Cp),
    )

    out = pl.pallas_call(
        tiny_dnn_kernel,
        out_shape=jax.ShapeDtypeStruct((B, Cp), x.dtype),
        grid_spec=pl.GridSpec(
            grid=grid,
            in_specs=[
                pl.BlockSpec((TB, I), lambda i: (i, 0)),    # x tile moves
                pl.BlockSpec((I, Hp), lambda i: (0, 0)),    # weights stay VMEM-resident
                pl.BlockSpec((1, Hp), lambda i: (0, 0)),
                pl.BlockSpec((Hp, Cp), lambda i: (0, 0)),
                pl.BlockSpec((1, Cp), lambda i: (0, 0)),
            ],
            out_specs=pl.BlockSpec((TB, Cp), lambda i: (i, 0)),
        ),
        compiler_params=pltpu.CompilerParams(
            # batch tiles are independent -> shard across cores on v7x
            dimension_semantics=("parallel",),
        ),
        cost_estimate=cost,
    )(x, w1p, b1p, w2p, b2p)

    # Strip the class lane-padding (kept inside jit so it fuses with consumers).
    return out[:, :num_classes]


def _reference(x, w1, b1, w2, b2):
    hp = jax.lax.Precision.HIGHEST
    h = jnp.maximum(jnp.dot(x, w1, precision=hp) + b1, 0.0)
    return jnp.dot(h, w2, precision=hp) + b2


if __name__ == "__main__":
    key = jax.random.PRNGKey(0)
    input_size, hidden_size, num_classes = 32, 64, 16

    k_x, k_w1, k_b1, k_w2, k_b2 = jax.random.split(key, 5)
    # deterministic "init" mimicking nn.Linear uniform(-1/sqrt(fan_in), 1/sqrt(fan_in))
    lim1 = 1.0 / jnp.sqrt(jnp.float32(input_size))
    lim2 = 1.0 / jnp.sqrt(jnp.float32(hidden_size))
    w1 = jax.random.uniform(k_w1, (input_size, hidden_size), jnp.float32, -lim1, lim1)
    b1 = jax.random.uniform(k_b1, (hidden_size,), jnp.float32, -lim1, lim1)
    w2 = jax.random.uniform(k_w2, (hidden_size, num_classes), jnp.float32, -lim2, lim2)
    b2 = jax.random.uniform(k_b2, (num_classes,), jnp.float32, -lim2, lim2)

    # Pad the weights ONCE (hoisted out of the per-call path).
    w1p, b1p, w2p, b2p = prepare_tiny_dnn_params(w1, b1, w2, b2)

    # Small sub-tile batch, a ragged batch (non-multiple of 8, exercises the
    # masked edge block), and a multi-tile batch that exercises the grid.
    for batch in (8, 250, 2048):
        x = jax.random.normal(k_x, (batch, input_size), dtype=jnp.float32)
        out = tiny_dnn(x, w1p, b1p, w2p, b2p, num_classes=num_classes)
        out = jax.block_until_ready(out)
        ref = _reference(x, w1, b1, w2, b2)
        assert out.shape == (batch, num_classes)
        assert jnp.allclose(out, ref, atol=1e-5, rtol=1e-5), (
            f"mismatch at batch={batch}: max abs err "
            f"{jnp.max(jnp.abs(out - ref)):.3e}"
        )

    print("KERNEL_OK")
</pallas_src>

<mosaic_0001>
module attributes {stable_mosaic.version = 11 : i64} {
  func.func @tiny_dnn_kernel(%arg0: i32, %arg1: memref<8x32xf32, #tpu.memory_space<vmem>>, %arg2: memref<32x128xf32, #tpu.memory_space<vmem>>, %arg3: memref<1x128xf32, #tpu.memory_space<vmem>>, %arg4: memref<128x128xf32, #tpu.memory_space<vmem>>, %arg5: memref<1x128xf32, #tpu.memory_space<vmem>>, %arg6: memref<8x128xf32, #tpu.memory_space<vmem>>) attributes {dimension_semantics = [#tpu.dimension_semantics<parallel>], iteration_bounds = array<i64: 1>, scalar_prefetch = 0 : i64, scratch_operands = 0 : i64, tpu.core_type = #tpu.core_type<tc>, window_params = [{transform_indices = @transform_0, window_bounds = array<i64: 8, 32>}, {pipeline_mode = #tpu.pipeline_mode<synchronous>, transform_indices = @transform_1, window_bounds = array<i64: 32, 128>}, {pipeline_mode = #tpu.pipeline_mode<synchronous>, transform_indices = @transform_2, window_bounds = array<i64: 1, 128>}, {pipeline_mode = #tpu.pipeline_mode<synchronous>, transform_indices = @transform_3, window_bounds = array<i64: 128, 128>}, {pipeline_mode = #tpu.pipeline_mode<synchronous>, transform_indices = @transform_4, window_bounds = array<i64: 1, 128>}, {transform_indices = @transform_5, window_bounds = array<i64: 8, 128>}]} {
    %c0 = arith.constant 0 : index
    %c0_0 = arith.constant 0 : index
    %0 = vector.load %arg1[%c0, %c0_0] : memref<8x32xf32, #tpu.memory_space<vmem>>, vector<8x32xf32>
    %c0_1 = arith.constant 0 : index
    %c0_2 = arith.constant 0 : index
    %1 = vector.load %arg2[%c0_1, %c0_2] : memref<32x128xf32, #tpu.memory_space<vmem>>, vector<32x128xf32>
    %cst = arith.constant dense<0.000000e+00> : vector<8x128xf32>
    %2 = tpu.matmul %0, %1, %cst {dimension_numbers = #tpu.dot_dimension_numbers<[1], [0], [0], [1], [0, 0, 1, 1], [], []>, precision = #tpu.contract_precision<fp32>} : vector<8x32xf32>, vector<32x128xf32>, vector<8x128xf32> -> vector<8x128xf32>
    %c0_3 = arith.constant 0 : index
    %c0_4 = arith.constant 0 : index
    %3 = vector.load %arg3[%c0_3, %c0_4] : memref<1x128xf32, #tpu.memory_space<vmem>>, vector<1x128xf32>
    %4 = vector.broadcast %3 : vector<1x128xf32> to vector<8x128xf32>
    %5 = arith.addf %2, %4 : vector<8x128xf32>
    %cst_5 = arith.constant 0.000000e+00 : f32
    %6 = vector.broadcast %cst_5 : f32 to vector<8x128xf32>
    %7 = arith.maximumf %5, %6 : vector<8x128xf32>
    %c0_6 = arith.constant 0 : index
    %c0_7 = arith.constant 0 : index
    %8 = vector.load %arg4[%c0_6, %c0_7] : memref<128x128xf32, #tpu.memory_space<vmem>>, vector<128x128xf32>
    %cst_8 = arith.constant dense<0.000000e+00> : vector<8x128xf32>
    %9 = tpu.matmul %7, %8, %cst_8 {dimension_numbers = #tpu.dot_dimension_numbers<[1], [0], [0], [1], [0, 0, 1, 1], [], []>, precision = #tpu.contract_precision<fp32>} : vector<8x128xf32>, vector<128x128xf32>, vector<8x128xf32> -> vector<8x128xf32>
    %c0_9 = arith.constant 0 : index
    %c0_10 = arith.constant 0 : index
    %10 = vector.load %arg5[%c0_9, %c0_10] : memref<1x128xf32, #tpu.memory_space<vmem>>, vector<1x128xf32>
    %11 = vector.broadcast %10 : vector<1x128xf32> to vector<8x128xf32>
    %12 = arith.addf %9, %11 : vector<8x128xf32>
    %c0_11 = arith.constant 0 : index
    %c0_12 = arith.constant 0 : index
    %13 = vector.load %arg6[%c0_11, %c0_12] : memref<8x128xf32, #tpu.memory_space<vmem>>, vector<8x128xf32>
    tpu.vector_store %arg6[%c0_11, %c0_12], %12 {strides = array<i32>} : memref<8x128xf32, #tpu.memory_space<vmem>>, vector<8x128xf32>,
    return
  }
  func.func @transform_0(%arg0: i32) -> (i32, i32) {
    %c0_i32 = arith.constant 0 : i32
    %c0_i32_0 = arith.constant 0 : i32
    return %arg0, %c0_i32 : i32, i32
  }
  func.func @transform_1(%arg0: i32) -> (i32, i32) {
    %c0_i32 = arith.constant 0 : i32
    %c0_i32_0 = arith.constant 0 : i32
    %c0_i32_1 = arith.constant 0 : i32
    return %c0_i32, %c0_i32_0 : i32, i32
  }
  func.func @transform_2(%arg0: i32) -> (i32, i32) {
    %c0_i32 = arith.constant 0 : i32
    %c0_i32_0 = arith.constant 0 : i32
    %c0_i32_1 = arith.constant 0 : i32
    return %c0_i32, %c0_i32_0 : i32, i32
  }
  func.func @transform_3(%arg0: i32) -> (i32, i32) {
    %c0_i32 = arith.constant 0 : i32
    %c0_i32_0 = arith.constant 0 : i32
    %c0_i32_1 = arith.constant 0 : i32
    return %c0_i32, %c0_i32_0 : i32, i32
  }
  func.func @transform_4(%arg0: i32) -> (i32, i32) {
    %c0_i32 = arith.constant 0 : i32
    %c0_i32_0 = arith.constant 0 : i32
    %c0_i32_1 = arith.constant 0 : i32
    return %c0_i32, %c0_i32_0 : i32, i32
  }
  func.func @transform_5(%arg0: i32) -> (i32, i32) {
    %c0_i32 = arith.constant 0 : i32
    %c0_i32_0 = arith.constant 0 : i32
    return %arg0, %c0_i32 : i32, i32
  }
}

</mosaic_0001>

<bundles_post_ra>
// kernel: tiny_dnn.1
= control target key start
LH: loop header
LB: loop body
LE: loop exit
PB: predicated region body
PF: predicated region fallthrough
CT: control target
= control target key end

     0   :  { %10 = vsyncpa [#allocation3], 0  ;;  %s1079_s0 = inlined_call_operand.hbm [shape: f32[8,32], index: 0, kind: input, shape index: {}]   ;;  %s1080_s1 = inlined_call_operand.hbm [shape: f32[32,128], index: 1, kind: input, shape index: {}]   ;;  %s1081_s2 = inlined_call_operand.vmem [shape: f32[1,128], index: 2, kind: input, shape index: {}]   ;;  %s1082_s3 = inlined_call_operand.hbm [shape: f32[128,128], index: 3, kind: input, shape index: {}]   ;;  %s1083_s4 = inlined_call_operand.vmem [shape: f32[1,128], index: 4, kind: input, shape index: {}]   ;;  %s1084_s5 = inlined_call_operand.hbm [shape: f32[8,128], index: 5, kind: output, shape index: {}]  }
   0x1   :  { %11 = vsyncpa [#allocation6], 0  ;;  %s28_s20 = sshll.u32 %s1080_s1, 4  ;;  %s29_s20 = int_to_ptr.hbm [resolvable:$true] %s28_s20 }
   0x2   :  { %12 = vsyncpa [#allocation4], 0  ;;  %s755_s21 = smov [#allocation5]   ;;  %s18_s25 = sshll.u32 %s1079_s0, 4  ;;  %s19_s25 = int_to_ptr.hbm [resolvable:$true] %s18_s25 }
   0x3   :  { %s30_s22 = sshll.u32 %s755_s21, 4  ;;  %s756_s26 = smov 128   ;;  %s31_s22 = int_to_ptr.vmem [resolvable:$true] %s30_s22 }
   0x4   :  { %s757_s27 = smov 8   ;;  %s758_s28 = smov [#allocation2]  }
   0x5   :  { %36 = dma.hbm_to_vmem [thread:$0]  %s29_s20, 512, %s31_s22, [#allocation6], %s756_s26, %s756_s26, %s757_s27  }
   0x6   :  { %s20_s29 = sshll.u32 %s758_s28, 4  ;;  %s43_s7 = sshll.u32 %s1082_s3, 4  ;;  %s21_s29 = int_to_ptr.vmem [resolvable:$true] %s20_s29  ;;  %s44_s7 = int_to_ptr.hbm [resolvable:$true] %s43_s7 }
   0x7   :  { %23 = dma.hbm_to_vmem [thread:$0]  %s19_s25, 128, %s21_s29, [#allocation3]  }
   0x8   :  { %s759_s1 = smov [#allocation7]  }
   0x9   :  { %s45_s8 = sshll.u32 %s759_s1, 4  ;;  %s46_s8 = int_to_ptr.vmem [resolvable:$true] %s45_s8 }
   0xa   :  { %51 = dma.hbm_to_vmem [thread:$0]  %s44_s7, 2048, %s46_s8, [#allocation6], %s756_s26, %s756_s26, %s757_s27  }
   0xb   :  { %749 = dma.done.wait [#allocation3], 128  }
   0xc   :  { %750 = vsyncadd [#allocation3], 4294967168 }
   0xd   :  { %751 = dma.done.wait [#allocation6], 2560  }
   0xe   :  { %752 = vsyncadd [#allocation6], 4294964736  ;;  %vm75_vm0 = vcmask 261120   ;;  %v70_v0 = vld [vmem:[#allocation5 + $0x18] sm:$0xff]  ;;  %v69_v1 = vld [vmem:[#allocation5 + $0x10] sm:$0xff]  ;;  %s760_s10 = smov [#allocation8]  }
   0xf   :  { %v68_v2 = vld [vmem:[#allocation5 + $0x8] sm:$0xff]  ;;  %v800_v3 = vand.u32 4294901760, %v70_v0  ;;  %v802_v4 = vand.u32 4294901760, %v69_v1  ;;  %v67_v6 = vld [vmem:[#allocation5] sm:$0xff]  ;;  %v66_v7 = vld [vmem:[#allocation2] sm:$0xff]  ;;  %s632_s11 = sshll.u32 %s760_s10, 4  ;;  %s633_s11 = int_to_ptr.vmem [resolvable:$true] %s632_s11 }
  0x10   :  { %v804_v5 = vand.u32 4294901760, %v68_v2  ;;  %v806_v8 = vand.u32 4294901760, %v67_v6  ;;  %v77_v9 = vsel %vm75_vm0, %v66_v7, 0  ;;  %v280_v10 = vld [vmem:[#allocation7 + $0x78] sm:$0xff]  ;;  %v279_v11 = vld [vmem:[#allocation7 + $0x70] sm:$0xff]  ;;  %v278_v12 = vld [vmem:[#allocation7 + $0x68] sm:$0xff] }
  0x11   :  { %92 = vmatpush.msra.mxu0 %v800_v3  ;;  %v810_v13 = vsub.f32 %v70_v0, %v800_v3  ;;  %v812_v14 = vand.u32 4294901760, %v77_v9  ;;  %v815_v15 = vsub.f32 %v69_v1, %v802_v4  ;;  %v823_v18 = vand.u32 4294901760, %v280_v10  ;;  %v277_v37 = vld [vmem:[#allocation7 + $0x60] sm:$0xff]  ;;  %v276_v38 = vld [vmem:[#allocation7 + $0x58] sm:$0xff]  ;;  %v275_v39 = vld [vmem:[#allocation7 + $0x50] sm:$0xff]  ;;  %s634_s14 = sshll.u32 %s1084_s5, 4  ;;  %s635_s14 = int_to_ptr.hbm [resolvable:$true] %s634_s14 }
  0x12   :  { %v818_v16 = vsub.f32 %v68_v2, %v804_v5  ;;  %v821_v17 = vsub.f32 %v67_v6, %v806_v8  ;;  %v825_v19 = vand.u32 4294901760, %v279_v11  ;;  %v827_v20 = vand.u32 4294901760, %v278_v12  ;;  %v274_v43 = vld [vmem:[#allocation7 + $0x48] sm:$0xff]  ;;  %v273_v48 = vld [vmem:[#allocation7 + $0x40] sm:$0xff]  ;;  %v272_v53 = vld [vmem:[#allocation7 + $0x38] sm:$0xff] }
  0x13   :  { %94 = vmatpush.msra.mxu0 %v802_v4  ;;  %v122_v21 = vand.u32 4294901760, %v810_v13  ;;  %v832_v22 = vsub.f32 %v77_v9, %v812_v14  ;;  %v128_v23 = vand.u32 4294901760, %v815_v15  ;;  %v838_v26 = vsub.f32 %v280_v10, %v823_v18  ;;  %286 = vmatpush.msra.mxu2 %v823_v18  ;;  %v271_v54 = vld [vmem:[#allocation7 + $0x30] sm:$0xff]  ;;  %v270_v63 = vld [vmem:[#allocation7 + $0x28] sm:$0xff] }
  0x14   :  { %v134_v24 = vand.u32 4294901760, %v818_v16  ;;  %v140_v25 = vand.u32 4294901760, %v821_v17  ;;  %v841_v27 = vsub.f32 %v279_v11, %v825_v19  ;;  %v844_v28 = vsub.f32 %v278_v12, %v827_v20 }
  0x15   :  { %96 = vmatpush.msra.mxu0 %v804_v5  ;;  %v123_v29 = vsub.f32 %v810_v13, %v122_v21  ;;  %v101_v30 = vand.u32 4294901760, %v832_v22  ;;  %v129_v31 = vsub.f32 %v815_v15, %v128_v23  ;;  %v328_v34 = vand.u32 4294901760, %v838_v26  ;;  %288 = vmatpush.msra.mxu2 %v825_v19 }
  0x16   :  { %v135_v32 = vsub.f32 %v818_v16, %v134_v24  ;;  %v141_v33 = vsub.f32 %v821_v17, %v140_v25  ;;  %v334_v35 = vand.u32 4294901760, %v841_v27  ;;  %v340_v36 = vand.u32 4294901760, %v844_v28 }
  0x17   :  { %98 = vmatpush.msra.mxu0 %v806_v8  ;;  %v124_v40 = vand.u32 4294901760, %v123_v29  ;;  %v102_v41 = vsub.f32 %v832_v22, %v101_v30  ;;  %v130_v42 = vand.u32 4294901760, %v129_v31  ;;  %v329_v45 = vsub.f32 %v838_v26, %v328_v34  ;;  %290 = vmatpush.msra.mxu2 %v827_v20 }
  0x18   :  { %v136_v44 = vand.u32 4294901760, %v135_v32  ;;  %v335_v46 = vsub.f32 %v841_v27, %v334_v35  ;;  %v341_v47 = vsub.f32 %v844_v28, %v340_v36  ;;  %v880_v50 = vand.u32 4294901760, %v277_v37 }
  0x19   :  { %163 = vmatpush.msrb.mxu0 %v810_v13  ;;  %125 = vmatpush.msra.mxu1 %v124_v40  ;;  %v103_v49 = vand.u32 4294901760, %v102_v41  ;;  %v882_v51 = vand.u32 4294901760, %v276_v38  ;;  %v884_v52 = vand.u32 4294901760, %v275_v39  ;;  %v142_v55 = vand.u32 4294901760, %v141_v33 }
  0x1a   :  { %v330_v56 = vand.u32 4294901760, %v329_v45  ;;  %v336_v57 = vand.u32 4294901760, %v335_v46  ;;  %v887_v58 = vand.u32 4294901760, %v274_v43  ;;  %v890_v59 = vsub.f32 %v277_v37, %v880_v50  ;;  %292 = vmatpush.msra.mxu2 %v880_v50 }
  0x1b   :  { %166 = vmatpush.msrb.mxu0 %v815_v15  ;;  %131 = vmatpush.msra.mxu1 %v130_v42  ;;  %v893_v60 = vsub.f32 %v276_v38, %v882_v51  ;;  %v896_v61 = vsub.f32 %v275_v39, %v884_v52  ;;  %v898_v62 = vand.u32 4294901760, %v273_v48  ;;  %v342_v0 = vand.u32 4294901760, %v341_v47  ;;  %v268_v39 = vld [vmem:[#allocation7 + $0x18] sm:$0xff] }
  0x1c   :  { %104 = vmatmul.f32.vlgmr.msra.gmra.mxu0 %v103_v49  ;;  %331 = vmatpush.msra.mxu3 %v330_v56  ;;  %v902_v1 = vsub.f32 %v274_v43, %v887_v58  ;;  %v904_v2 = vand.u32 4294901760, %v272_v53  ;;  %v906_v6 = vand.u32 4294901760, %v271_v54  ;;  %v346_v7 = vand.u32 4294901760, %v890_v59 }
  0x1d   :  { %169 = vmatpush.msrb.mxu0 %v818_v16  ;;  %137 = vmatpush.msra.mxu1 %v136_v44  ;;  %v352_v9 = vand.u32 4294901760, %v893_v60  ;;  %v358_v10 = vand.u32 4294901760, %v896_v61  ;;  %v913_v11 = vsub.f32 %v273_v48, %v898_v62  ;;  %v920_v31 = vand.u32 4294901760, %v270_v63 }
  0x1e   :  { %337 = vmatpush.msra.mxu3 %v336_v57  ;;  %v364_v12 = vand.u32 4294901760, %v902_v1  ;;  %v918_v29 = vsub.f32 %v272_v53, %v904_v2  ;;  %v347_v32 = vsub.f32 %v890_v59, %v346_v7  ;;  %v936_v13 = vsub.f32 %v271_v54, %v906_v6  ;;  %294 = vmatpush.msra.mxu2 %v882_v51 }
  0x1f   :  { %172 = vmatpush.msrb.mxu0 %v821_v17  ;;  %143 = vmatpush.msra.mxu1 %v142_v55  ;;  %v353_v33 = vsub.f32 %v893_v60, %v352_v9  ;;  %v359_v37 = vsub.f32 %v896_v61, %v358_v10  ;;  %v370_v38 = vand.u32 4294901760, %v913_v11  ;;  %v947_v44 = vsub.f32 %v270_v63, %v920_v31 }
  0x20   :  { %145 = vmatmul.f32.vlgmr.msra.gmra.mxu1 %v812_v14  ;;  %343 = vmatpush.msra.mxu3 %v342_v0  ;;  %v348_v40 = vand.u32 4294901760, %v347_v32  ;;  %v365_v42 = vsub.f32 %v902_v1, %v364_v12  ;;  %v376_v43 = vand.u32 4294901760, %v918_v29  ;;  %v953_v15 = vand.u32 4294901760, %v268_v39  ;;  %v266_v0 = vld [vmem:[#allocation7 + $0x8] sm:$0xff] }
  0x21   :  { %221 = vmatpush.msra.mxu0 %v122_v21  ;;  %v269_v21 = vld [vmem:[#allocation7 + $0x20] sm:$0xff]  ;;  %192 = vmatpush.msrb.mxu1 %v800_v3  ;;  %v354_v41 = vand.u32 4294901760, %v353_v33  ;;  %v371_v46 = vsub.f32 %v913_v11, %v370_v38  ;;  %v382_v47 = vand.u32 4294901760, %v936_v13  ;;  %v388_v49 = vand.u32 4294901760, %v947_v44 }
  0x22   :  { %v951_v45 = vand.u32 4294901760, %v269_v21  ;;  %349 = vmatpush.msra.mxu3 %v348_v40  ;;  %296 = vmatpush.msra.mxu2 %v884_v52  ;;  %v366_v16 = vand.u32 4294901760, %v365_v42  ;;  %v973_v53 = vsub.f32 %v268_v39, %v953_v15  ;;  %v313_v33 = vand.u32 4294901760, %v266_v0 }
  0x23   :  { %225 = vmatpush.msra.mxu0 %v128_v23  ;;  %194 = vmatpush.msrb.mxu1 %v802_v4  ;;  %v360_v23 = vand.u32 4294901760, %v359_v37  ;;  %v372_v17 = vand.u32 4294901760, %v371_v46  ;;  %v389_v56 = vsub.f32 %v947_v44, %v388_v49  ;;  %v265_v37 = vld [vmem:[#allocation7] sm:$0xff] }
  0x24   :  { %175 = vmatmul.f32.vlgmr.msrb.gmra.mxu0 %v832_v22  ;;  %v964_v48 = vsub.f32 %v269_v21, %v951_v45  ;;  %355 = vmatpush.msra.mxu3 %v354_v41  ;;  %v400_v22 = vand.u32 4294901760, %v973_v53  ;;  %v411_v39 = vsub.f32 %v266_v0, %v313_v33  ;;  %v315_v40 = vand.u32 4294901760, %v265_v37 }
  0x25   :  { %229 = vmatpush.msra.mxu0 %v134_v24  ;;  %196 = vmatpush.msrb.mxu1 %v804_v5  ;;  %v377_v24 = vsub.f32 %v918_v29, %v376_v43  ;;  %v390_v57 = vand.u32 4294901760, %v389_v56 }
  0x26   :  { %298 = vmatpush.msra.mxu2 %v887_v58  ;;  %361 = vmatpush.msra.mxu3 %v360_v23  ;;  %v394_v54 = vand.u32 4294901760, %v964_v48  ;;  %v401_v63 = vsub.f32 %v973_v53, %v400_v22  ;;  %v412_v42 = vand.u32 4294901760, %v411_v39  ;;  %v417_v23 = vsub.f32 %v265_v37, %v315_v40 }
  0x27   :  { %233 = vmatpush.msra.mxu0 %v140_v25  ;;  %198 = vmatpush.msrb.mxu1 %v806_v8  ;;  %v383_v25 = vsub.f32 %v936_v13, %v382_v47  ;;  %v378_v55 = vand.u32 4294901760, %v377_v24 }
  0x28   :  { %202 = vmatmul.f32.vlgmr.msrb.gmra.mxu1 %v101_v30  ;;  %300 = vmatpush.msra.mxu2 %v898_v62  ;;  %v418_v24 = vand.u32 4294901760, %v417_v23 }
  0x29   :  { %252 = vmatpush.msra.mxu1 %v800_v3  ;;  %367 = vmatpush.msra.mxu3 %v366_v16  ;;  %v384_v30 = vand.u32 4294901760, %v383_v25  ;;  %v395_v3 = vsub.f32 %v964_v48, %v394_v54  ;;  %v413_v16 = vsub.f32 %v411_v39, %v412_v42 }
  0x2a   :  { %429 = vmatpush.msrb.mxu0 %v838_v26  ;;  %302 = vmatpush.msra.mxu2 %v904_v2  ;;  %v419_v25 = vsub.f32 %v417_v23, %v418_v24 }
  0x2b   :  { %254 = vmatpush.msra.mxu1 %v802_v4  ;;  %373 = vmatpush.msra.mxu3 %v372_v17  ;;  %v396_v4 = vand.u32 4294901760, %v395_v3  ;;  %v414_v17 = vand.u32 4294901760, %v413_v16 }
  0x2c   :  { %235 = vmatmul.f32.vlgmr.msra.gmra.mxu0 %v812_v14  ;;  %304 = vmatpush.msra.mxu2 %v906_v6 }
  0x2d   :  { %256 = vmatpush.msra.mxu1 %v804_v5  ;;  %432 = vmatpush.msrb.mxu0 %v841_v27  ;;  %v402_v5 = vand.u32 4294901760, %v401_v63 }
  0x2e   :  { %379 = vmatpush.msra.mxu3 %v378_v55  ;;  %306 = vmatpush.msra.mxu2 %v920_v31  ;;  %v420_v55 = vand.u32 4294901760, %v419_v25 }
  0x2f   :  { %258 = vmatpush.msra.mxu1 %v806_v8  ;;  %435 = vmatpush.msrb.mxu0 %v844_v28  ;;  %v267_v8 = vld [vmem:[#allocation7 + $0x10] sm:$0xff] }
  0x30   :  { %260 = vmatmul.f32.vlgmr.msra.gmra.mxu1 %v812_v14  ;;  %385 = vmatpush.msra.mxu3 %v384_v30  ;;  %v311_v14 = vand.u32 4294901760, %v267_v8 }
  0x31   :  { %482 = vmatpush.msrb.mxu1 %v823_v18  ;;  %438 = vmatpush.msrb.mxu0 %v890_v59 }
  0x32   :  { %391 = vmatpush.msra.mxu3 %v390_v57  ;;  %308 = vmatpush.msra.mxu2 %v951_v45  ;;  %v405_v32 = vsub.f32 %v267_v8, %v311_v14 }
  0x33   :  { %484 = vmatpush.msrb.mxu1 %v825_v19  ;;  %441 = vmatpush.msrb.mxu0 %v893_v60 }
  0x34   :  { %397 = vmatpush.msra.mxu3 %v396_v4  ;;  %310 = vmatpush.msra.mxu2 %v953_v15  ;;  %v406_v21 = vand.u32 4294901760, %v405_v32 }
  0x35   :  { %486 = vmatpush.msrb.mxu1 %v827_v20  ;;  %444 = vmatpush.msrb.mxu0 %v896_v61 }
  0x36   :  { %403 = vmatpush.msra.mxu3 %v402_v5  ;;  %312 = vmatpush.msra.mxu2 %v311_v14  ;;  %v407_v41 = vsub.f32 %v405_v32, %v406_v21 }
  0x37   :  { %488 = vmatpush.msrb.mxu1 %v880_v50  ;;  %447 = vmatpush.msrb.mxu0 %v902_v1 }
  0x38   :  { %314 = vmatpush.msra.mxu2 %v313_v33  ;;  %v408_v46 = vand.u32 4294901760, %v407_v41 }
  0x39   :  { %490 = vmatpush.msrb.mxu1 %v882_v51  ;;  %450 = vmatpush.msrb.mxu0 %v913_v11 }
  0x3a   :  { %316 = vmatpush.msra.mxu2 %v315_v40  ;;  %409 = vmatpush.msra.mxu3 %v408_v46 }
  0x3b   :  { %492 = vmatpush.msrb.mxu1 %v884_v52  ;;  %453 = vmatpush.msrb.mxu0 %v918_v29 }
  0x3c   :  { %523 = vmatpush.msrb.mxu2 %v328_v34  ;;  %415 = vmatpush.msra.mxu3 %v414_v17 }
  0x3d   :  { %494 = vmatpush.msrb.mxu1 %v887_v58  ;;  %456 = vmatpush.msrb.mxu0 %v936_v13 }
  0x3e   :  { %527 = vmatpush.msrb.mxu2 %v334_v35  ;;  %421 = vmatpush.msra.mxu3 %v420_v55 }
  0x3f   :  { %496 = vmatpush.msrb.mxu1 %v898_v62  ;;  %459 = vmatpush.msrb.mxu0 %v947_v44 }
  0x40   :  { %531 = vmatpush.msrb.mxu2 %v340_v36  ;;  %590 = vmatpush.msrb.mxu3 %v823_v18 }
  0x41   :  { %498 = vmatpush.msrb.mxu1 %v904_v2  ;;  %462 = vmatpush.msrb.mxu0 %v964_v48 }
  0x42   :  { %535 = vmatpush.msrb.mxu2 %v346_v7  ;;  %592 = vmatpush.msrb.mxu3 %v825_v19  ;;  %v651_v19 = vld [vmem:[%s1081_s2] ss:$0 sm:$0xff] }
  0x43   :  { %500 = vmatpush.msrb.mxu1 %v906_v6  ;;  %465 = vmatpush.msrb.mxu0 %v973_v53 }
  0x44   :  { %539 = vmatpush.msrb.mxu2 %v352_v9  ;;  %594 = vmatpush.msrb.mxu3 %v827_v20 }
  0x45   :  { %502 = vmatpush.msrb.mxu1 %v920_v31  ;;  %468 = vmatpush.msrb.mxu0 %v405_v32 }
  0x46   :  { %543 = vmatpush.msrb.mxu2 %v358_v10  ;;  %596 = vmatpush.msrb.mxu3 %v880_v50 }
  0x47   :  { %504 = vmatpush.msrb.mxu1 %v951_v45  ;;  %471 = vmatpush.msrb.mxu0 %v411_v39 }
  0x48   :  { %547 = vmatpush.msrb.mxu2 %v364_v12  ;;  %598 = vmatpush.msrb.mxu3 %v882_v51 }
  0x49   :  { %506 = vmatpush.msrb.mxu1 %v953_v15  ;;  %474 = vmatpush.msrb.mxu0 %v417_v23 }
  0x4a   :  { %551 = vmatpush.msrb.mxu2 %v370_v38  ;;  %600 = vmatpush.msrb.mxu3 %v884_v52 }
  0x4b   :  { %508 = vmatpush.msrb.mxu1 %v311_v14 }
  0x4c   :  { %555 = vmatpush.msrb.mxu2 %v376_v43  ;;  %602 = vmatpush.msrb.mxu3 %v887_v58 }
  0x4d   :  { %510 = vmatpush.msrb.mxu1 %v313_v33 }
  0x4e   :  { %559 = vmatpush.msrb.mxu2 %v382_v47  ;;  %604 = vmatpush.msrb.mxu3 %v898_v62 }
  0x4f   :  { %512 = vmatpush.msrb.mxu1 %v315_v40 }
  0x50   :  { %563 = vmatpush.msrb.mxu2 %v388_v49  ;;  %606 = vmatpush.msrb.mxu3 %v904_v2 }
  0x52   :  { %567 = vmatpush.msrb.mxu2 %v394_v54  ;;  %608 = vmatpush.msrb.mxu3 %v906_v6  ;;  %v652_v6 = vld [vmem:[%s1083_s4] ss:$0 sm:$0xff] }
  0x54   :  { %571 = vmatpush.msrb.mxu2 %v400_v22  ;;  %610 = vmatpush.msrb.mxu3 %v920_v31 }
  0x56   :  { %575 = vmatpush.msrb.mxu2 %v406_v21  ;;  %612 = vmatpush.msrb.mxu3 %v951_v45 }
  0x58   :  { %579 = vmatpush.msrb.mxu2 %v412_v42  ;;  %614 = vmatpush.msrb.mxu3 %v953_v15 }
  0x5a   :  { %583 = vmatpush.msrb.mxu2 %v418_v24  ;;  %616 = vmatpush.msrb.mxu3 %v311_v14 }
  0x5c   :  { %618 = vmatpush.msrb.mxu3 %v313_v33 }
  0x5e   :  { %620 = vmatpush.msrb.mxu3 %v315_v40 }
  0x99   :  { %v105_v18 = vpop.f32.mrf.mxu0 }
  0x9a   :  { %v106_v26 = vadd.f32 %v651_v19, %v105_v18 }
  0x9d   :  { %v146_v20 = vpop.f32.mrf.mxu1 }
  0x9e   :  { %v147_v28 = vadd.f32 %v146_v20, %v106_v26 }
  0xa1   :  { %v176_v27 = vpop.f32.mrf.mxu0 }
  0xa2   :  { %v177_v35 = vadd.f32 %v176_v27, %v147_v28 }
  0xa5   :  { %v203_v34 = vpop.f32.mrf.mxu1 }
  0xa6   :  { %v204_v36 = vadd.f32 %v203_v34, %v177_v35 }
  0xa9   :  { %v236_v50 = vpop.f32.mrf.mxu0 }
  0xaa   :  { %v237_v51 = vadd.f32 %v236_v50, %v204_v36 }
  0xad   :  { %v261_v52 = vpop.f32.mrf.mxu1 }
  0xae   :  { %v262_v58 = vadd.f32 %v261_v52, %v237_v51 }
  0xb0   :  { %v264_v59 = vmax.f32 %v262_v58, 0.0 }
  0xb2   :  { %v317_v60 = vand.u32 4294901760, %v264_v59 }
  0xb4   :  { %v318_v61 = vsub.f32 %v264_v59, %v317_v60  ;;  %423 = vmatmul.f32.vlgmr.msra.gmra.mxu3 %v317_v60 }
  0xb6   :  { %477 = vmatmul.f32.vlgmr.msrb.gmra.mxu0 %v318_v61  ;;  %v319_v62 = vand.u32 4294901760, %v318_v61 }
  0xb8   :  { %516 = vmatmul.f32.vlgmr.msrb.gmra.mxu1 %v319_v62  ;;  %v320_v1 = vsub.f32 %v318_v61, %v319_v62 }
  0xba   :  { %v321_v2 = vand.u32 4294901760, %v320_v1 }
  0xbc   :  { %322 = vmatmul.f32.vlgmr.msra.gmra.mxu2 %v321_v2  ;;  %622 = vmatmul.f32.vlgmr.msrb.gmra.mxu3 %v317_v60 }
  0xc4   :  { %585 = vmatmul.f32.vlgmr.msrb.gmra.mxu2 %v317_v60 }
 0x133   :  { %v478_v12 = vpop.f32.mrf.mxu0 }
 0x135   :  { %v517_v31 = vpop.f32.mrf.mxu1 }
 0x137   :  { %v424_v7 = vpop.f32.mrf.mxu3 }
 0x13f   :  { %v323_v9 = vpop.f32.mrf.mxu2  ;;  %v623_v44 = vpop.f32.mrf.mxu3 }
 0x140   :  { %v324_v10 = vadd.f32 %v652_v6, %v323_v9 }
 0x142   :  { %v425_v11 = vadd.f32 %v424_v7, %v324_v10 }
 0x144   :  { %v479_v29 = vadd.f32 %v478_v12, %v425_v11 }
 0x146   :  { %v518_v38 = vadd.f32 %v517_v31, %v479_v29 }
 0x147   :  { %v586_v13 = vpop.f32.mrf.mxu2 }
 0x148   :  { %v587_v43 = vadd.f32 %v586_v13, %v518_v38 }
 0x14a   :  { %v624_v45 = vadd.f32 %v623_v44, %v587_v43 }
 0x14c   :  { %626 = vst [vmem:[#allocation8] sm:$0xff] %v624_v45 }
 0x14d   :  { %637 = dma.vmem_to_hbm [thread:$0]  %s633_s11, 128, %s635_s14, [#allocation4]  }
 0x14e   :  { %753 = dma.done.wait [#allocation4], 128  }
 0x14f   :  { %754 = vsyncadd [#allocation4], 4294967168 }
 0x150   :  { %642 = vsyncpa [#allocation3], 1 }
 0x151   :  { %643 = vsyncpa [#allocation6], 1 }
 0x152   :  { %644 = vsyncpa [#allocation4], 1 }

</bundles_post_ra>
